<compile_context>
chip_gen: v5e
topology: v5e:2x2
jax: 0.10.0
libtpu: 0.0.40
codegen_flags: <defaults>
</compile_context>

<pallas_src>
import math
from functools import lru_cache

import jax
import jax.numpy as jnp
from jax.experimental import pallas as pl
from jax.experimental.pallas import tpu as pltpu


def _build_pe(embed_dim: int, max_len: int = 100) -> jnp.ndarray:
    """Sinusoidal positional encoding table, shape (1, max_len, embed_dim)."""
    assert embed_dim % 2 == 0, "embed_dim must be even (matches PyTorch module)"
    position = jnp.arange(0, max_len, dtype=jnp.float32)[:, None]            # (L, 1)
    div_term = jnp.exp(
        jnp.arange(0, embed_dim, 2, dtype=jnp.float32)
        * (-math.log(10000.0) / embed_dim)
    )                                                                         # (D/2,)
    angles = position * div_term                                              # (L, D/2)
    # interleave: even cols = sin, odd cols = cos  (matches pe[:,0::2]/pe[:,1::2])
    pe = jnp.stack([jnp.sin(angles), jnp.cos(angles)], axis=-1)               # (L, D/2, 2)
    pe = pe.reshape(max_len, embed_dim)                                       # (L, D)
    return pe[None, :, :]                                                     # (1, L, D)


def _add_pe_kernel(x_ref, pe_ref, o_ref):
    # x_ref: (tb, tc) row tile of flattened x; pe_ref: (1, tc) broadcast row.
    o_ref[...] = x_ref[...] + pe_ref[...]


@lru_cache(maxsize=1)
def _tpu_budgets():
    """(target_bytes_per_buffer, vmem_limit_bytes), generation-aware."""
    try:
        info = pltpu.get_tpu_info()
        vmem_bytes = int(getattr(info, "vmem_capacity_bytes", 64 * 1024 * 1024))
    except Exception:
        vmem_bytes = 64 * 1024 * 1024  # conservative: assume v7x-class (64 MiB)
    if vmem_bytes <= 64 * 1024 * 1024:
        # v7x: 64 MiB physical -> ~4 MiB tiles, 48 MiB scoped limit (headroom
        # for Mosaic internal scratch).
        return 4 * 1024 * 1024, 48 * 1024 * 1024
    # v5e / v6e: 128 MiB physical -> bigger tiles, amortize ~0.35 us/step.
    return 6 * 1024 * 1024, 64 * 1024 * 1024


def _choose_tiles(B: int, N: int, D: int, itemsize: int, target_bytes: int):
    """Pick (row_tile, col_tile) for the flattened (B, N) add.

    Guarantees tb * tc * itemsize <= target_bytes: tc is budgeted for the
    *minimum* row tile (packed-sublane multiple of the dtype), then tb is
    rounded down, never up past the budget.
    """
    sub = max(8, 32 // itemsize)          # packed-sublane multiple: 8 f32, 16 bf16, 32 i8
    min_tb = min(B, sub)

    # ----- column tile -----
    full_row_fits = N * min_tb * itemsize <= target_bytes
    if full_row_fits:
        tc = N
    elif N % 128 == 0:
        col_budget = max(128, (target_bytes // (min_tb * itemsize)))
        tc = max(128, min(N, (col_budget // 128) * 128))
        while N % tc != 0:                # terminates at worst at tc == 128
            tc -= 128
    else:
        # Ragged last dim: split on multiples of D so blocks stay exact and
        # pe/x column windows stay aligned to embedding boundaries.
        S = N // D
        col_budget = max(D, (target_bytes // (min_tb * itemsize)))
        d_per_tile = max(1, min(S, col_budget // D))
        while S % d_per_tile != 0:        # terminates at d_per_tile == 1
            d_per_tile -= 1
        tc = d_per_tile * D

    # ----- row tile -----
    rows_budget = max(1, target_bytes // max(1, tc * itemsize))
    if B <= sub:
        tb = B                            # full extent is always legal
    else:
        tb = min(B, rows_budget)
        tb = max(sub, (tb // sub) * sub)  # round DOWN -> stays within budget
    return tb, tc


def _ensure_parallel_split(B: int, N: int, tb: int, tc: int, itemsize: int):
    """If the grid collapses to a single program, split so >=2 blocks exist
    along a parallel axis (feeds both TensorCores on v7x). Only splits when the
    resulting blocks stay layout-legal (multiples of 8 rows / 128 lanes)."""
    if pl.cdiv(B, tb) * pl.cdiv(N, tc) >= 2:
        return tb, tc
    sub = max(8, 32 // itemsize)
    if B >= 2 * sub:
        tb = max(sub, ((B // 2) // sub) * sub)
    elif N % 256 == 0:
        tc_new = max(128, ((N // 2) // 128) * 128)
        while N % tc_new != 0:
            tc_new -= 128
        tc = tc_new
    return tb, tc


@jax.jit
def positional_encoding_forward(x: jnp.ndarray, pe: jnp.ndarray) -> jnp.ndarray:
    """x: (B, S, D); pe: (1, max_len, D).  Returns x + pe[:, :S]."""
    B, S, D = x.shape
    N = S * D
    itemsize = jnp.dtype(x.dtype).itemsize

    # Wrapper-side glue: slice the table, match dtype, flatten to lane-dense 2D.
    pe2 = pe[0, :S, :].astype(x.dtype).reshape(1, N)   # (1, N)
    x2 = x.reshape(B, N)                               # (B, N)

    target_bytes, vmem_limit = _tpu_budgets()
    tb, tc = _choose_tiles(B, N, D, itemsize, target_bytes)
    tb, tc = _ensure_parallel_split(B, N, tb, tc, itemsize)

    # Grid order: column-tile axis j OUTER (slow), row axis i INNER (fast) so
    # pe's block index is unchanged between consecutive steps -> fetched only
    # once per column tile, effectively VMEM-resident.
    grid = (pl.cdiv(N, tc), pl.cdiv(B, tb))

    out2 = pl.pallas_call(
        _add_pe_kernel,
        out_shape=jax.ShapeDtypeStruct((B, N), x.dtype),
        grid=grid,
        in_specs=[
            pl.BlockSpec((tb, tc), lambda j, i: (i, j)),   # x tiles
            pl.BlockSpec((1, tc), lambda j, i: (0, j)),    # pe: constant over i
        ],
        out_specs=pl.BlockSpec((tb, tc), lambda j, i: (i, j)),
        compiler_params=pltpu.CompilerParams(
            dimension_semantics=("parallel", "parallel"),
            vmem_limit_bytes=int(vmem_limit),
        ),
    )(x2, pe2)

    return out2.reshape(B, S, D)


if __name__ == "__main__":
    B, S, D = 2, 8, 32
    MAX_LEN = 100

    key = jax.random.PRNGKey(0)
    x = jax.random.normal(key, (B, S, D), dtype=jnp.float32)

    pe = _build_pe(D, MAX_LEN)

    out = positional_encoding_forward(x, pe)
    out = jax.block_until_ready(out)

    # sanity check against plain-JAX reference
    ref = x + pe[:, :S, :]
    assert out.shape == (B, S, D)
    assert jnp.allclose(out, ref, atol=1e-6), "mismatch vs reference"

    print("KERNEL_OK")
</pallas_src>

<mosaic_0001>
module attributes {stable_mosaic.version = 11 : i64} {
  func.func @_add_pe_kernel(%arg0: i32, %arg1: i32, %arg2: memref<2x128xf32, #tpu.memory_space<vmem>>, %arg3: memref<1x128xf32, #tpu.memory_space<vmem>>, %arg4: memref<2x128xf32, #tpu.memory_space<vmem>>) attributes {dimension_semantics = [#tpu.dimension_semantics<parallel>, #tpu.dimension_semantics<parallel>], iteration_bounds = array<i64: 2, 1>, scalar_prefetch = 0 : i64, scratch_operands = 0 : i64, tpu.core_type = #tpu.core_type<tc>, window_params = [{transform_indices = @transform_0, window_bounds = array<i64: 2, 128>}, {transform_indices = @transform_1, window_bounds = array<i64: 1, 128>}, {transform_indices = @transform_2, window_bounds = array<i64: 2, 128>}]} {
    %c0 = arith.constant 0 : index
    %c0_0 = arith.constant 0 : index
    %0 = vector.load %arg2[%c0, %c0_0] : memref<2x128xf32, #tpu.memory_space<vmem>>, vector<2x128xf32>
    %c0_1 = arith.constant 0 : index
    %c0_2 = arith.constant 0 : index
    %1 = vector.load %arg3[%c0_1, %c0_2] : memref<1x128xf32, #tpu.memory_space<vmem>>, vector<1x128xf32>
    %2 = vector.broadcast %1 : vector<1x128xf32> to vector<2x128xf32>
    %3 = arith.addf %0, %2 : vector<2x128xf32>
    %c0_3 = arith.constant 0 : index
    %c0_4 = arith.constant 0 : index
    %4 = vector.load %arg4[%c0_3, %c0_4] : memref<2x128xf32, #tpu.memory_space<vmem>>, vector<2x128xf32>
    tpu.vector_store %arg4[%c0_3, %c0_4], %3 {strides = array<i32>} : memref<2x128xf32, #tpu.memory_space<vmem>>, vector<2x128xf32>,
    return
  }
  func.func @transform_0(%arg0: i32, %arg1: i32) -> (i32, i32) {
    %c0_i32 = arith.constant 0 : i32
    return %arg1, %arg0 : i32, i32
  }
  func.func @transform_1(%arg0: i32, %arg1: i32) -> (i32, i32) {
    %c0_i32 = arith.constant 0 : i32
    %c0_i32_0 = arith.constant 0 : i32
    return %c0_i32, %arg0 : i32, i32
  }
  func.func @transform_2(%arg0: i32, %arg1: i32) -> (i32, i32) {
    %c0_i32 = arith.constant 0 : i32
    return %arg1, %arg0 : i32, i32
  }
}

</mosaic_0001>

<bundles_post_ra>
// kernel: squeeze.1
= control target key start
LH: loop header
LB: loop body
LE: loop exit
PB: predicated region body
PF: predicated region fallthrough
CT: control target
= control target key end

     0   :  { %s7_s6 = smov 3  ;;  %s46_s9 = smov 96   ;;  %vm4_vm0 = vcmask 261120   ;;  %vm11_vm1 = vcmask 1048320   ;;  %vm18_vm2 = vcmask 785920   ;;  %vm25_vm3 = vcmask 523520   ;;  %s77_s0 = inlined_call_operand.vmem [shape: f32[1,8,32], index: 0, kind: input, shape index: {}]   ;;  %s78_s1 = inlined_call_operand.vmem [shape: f32[1,256], index: 1, kind: output, shape index: {}]  }
   0x1   :  { %v39_v0 = vld [vmem:[%s77_s0 + $0x3] ss:$4 sm:%s7_s6]   ;;  %s21_s10 = smov 3  ;;  %s14_s13 = smov 3 }
   0x2   :  { %9 = vrot.lane.b32.xlu0 %v39_v0, %s46_s9  ;;  %v41_v1 = vld [vmem:[%s77_s0 + $0x1] ss:$4 sm:%s21_s10]   ;;  %s47_s14 = smov 32   ;;  %s48_s17 = smov 64  }
   0x3   :  { %23 = vrot.lane.b32.xlu1 %v41_v1, %s47_s14  ;;  %v40_v2 = vld [vmem:[%s77_s0 + $0x2] ss:$4 sm:%s14_s13]   ;;  %s2_s18 = smov 3 }
   0x4   :  { %v3_v3 = vld [vmem:[%s77_s0] ss:$4 sm:%s2_s18]  }
   0x5   :  { %5 = vst.msk [vmem:[#allocation0] ss:$8 sm:$0x3] %vm4_vm0, %v3_v3  }
   0xa   :  { %16 = vrot.lane.b32.xlu0 %v40_v2, %s48_s17 }
  0x74   :  { %v10_v4 = vpop.permute.xlu0 %9  }
  0x75   :  { %12 = vst.msk [vmem:[#allocation0] ss:$8 sm:$0x3] %vm11_vm1, %v10_v4   ;;  %v24_v5 = vpop.permute.xlu1 %23  }
  0x7c   :  { %v17_v6 = vpop.permute.xlu0 %16  }
  0x7d   :  { %19 = vst.msk [vmem:[#allocation0] ss:$8 sm:$0x3] %vm18_vm2, %v17_v6  }
  0x7e   :  { %26 = vst.msk [vmem:[#allocation0] ss:$8 sm:$0x3] %vm25_vm3, %v24_v5  }
  0x85   :  { %v29_v7 = vld [vmem:[#allocation0] sm:$0x1]  ;;  %v34_v8 = vld [vmem:[#allocation0 + $0x8] sm:$0x1] }
  0x86   :  { %32 = vst [vmem:[%s78_s1] sm:$0x1] %v29_v7 }
  0x87   :  { %42 = vst [vmem:[%s78_s1 + $0x1] sm:$0x1] %v34_v8 }

// kernel: positional_encoding_forward.1
= control target key start
LH: loop header
LB: loop body
LE: loop exit
PB: predicated region body
PF: predicated region fallthrough
CT: control target
= control target key end

     0   :  { %s361_s9 = smov 0   ;;  %s363_s10 = smov 0   ;;  %s380_s0 = inlined_call_operand.vmem [shape: f32[2,256], index: 0, kind: input, shape index: {}]   ;;  %s381_s1 = inlined_call_operand.vmem [shape: f32[1,256], index: 1, kind: input, shape index: {}]   ;;  %s382_s2 = inlined_call_operand.vmem [shape: f32[2,256], index: 2, kind: output, shape index: {}]  }
   0x1   :  { %s342_s11 = smov 0  }
   0x2 LB: > { %s24_s12 = sadd.s32 1, %s340_s10  ;;  %p292_p0 = scmp.ge.s32.totalorder %s344_s11, 1  ;;  %s344_s11 = sphi %s342_s11, %s12_s11   ;;  %s340_s10 = sphi %s363_s10, %s384_s10   ;;  %s336_s9 = sphi %s361_s9, %s383_s9  }
   0x3   : > { %p26_p1 = scmp.ge.s32.totalorder %s24_s12, 2  ;;  %p139_p2 = scmp.lt.s32.totalorder %s344_s11, 3 }
   0x5   : > { %s386_s12 = smov (%p26_p1, %s24_s12), 0  ;;  %p140_p3 = pnand %p292_p0, %p139_p2 }
   0x6   : > { %p172_p4 = scmp.lt.s32.totalorder (!%p140_p3), %s336_s9, 1 }
   0x7   : > { %143 = sbr.rel (%p140_p3) target bundleno = 19 (0x13), region = 28 }
   0xc   : > { %s388_s9 = smov (!%p172_p4, %s336_s9), 1 }
   0xd   : > { %s293_s13 = sshll.u32 %s388_s9, 1  ;;  %s180_s16 = scalar_lea.vmem %s381_s1, %s388_s9 }
   0xe   : > { %s177_s19 = scalar_lea.vmem %s380_s0, %s293_s13  ;;  %v321_v0 = vld [vmem:[%s180_s16] ss:$0 sm:$0xff]  ;;  %s188_s22 = scalar_lea.vmem %s382_s2, %s293_s13 }
   0xf   : > { %v189_v1 = vld [vmem:[%s177_s19] sm:$0x3] }
  0x10   : > { %v194_v2 = vadd.f32 %v321_v0, %v189_v1 }
  0x12   : > { %195 = vst [vmem:[%s188_s22] sm:$0x3] %v194_v2 }
  0x13 PF: > { %s12_s11 = sadd.s32 1, %s344_s11   ;;  %s383_s9 = smov %s340_s10 }
  0x14   : > { %p9_p5 = scmp.ge.s32.totalorder %s12_s11, 4   ;;  %s384_s10 = smov %s386_s12 }
  0x16   :  { %11 = sbr.rel (!%p9_p5) target bundleno = 2 (0x2), region = 61 }

</bundles_post_ra>
